<compile_context>
chip_gen: v6e
topology: v6e:2x2x1
jax: 0.10.0
libtpu: 0.0.40
codegen_flags: <defaults>
</compile_context>

<pallas_src>
import numpy as np
import jax
import jax.numpy as jnp
from jax.experimental import pallas as pl
from jax.experimental.pallas import tpu as pltpu


def _round_up(x, m):
    return ((x + m - 1) // m) * m


# ----------------------------- fused kernel ------------------------------ #
def _qnet_kernel(x_ref, w0_ref, b0_ref, w1_ref, b1_ref,
                 wf_ref, bf_ref, wo_ref, bo_ref, o_ref):
    # bf16 MXU matmuls with f32 accumulation; bias + ReLU in f32 on the VPU.
    a = jnp.dot(x_ref[...], w0_ref[...],
                preferred_element_type=jnp.float32) + b0_ref[...]
    a = jnp.maximum(a, 0.0)
    a = jnp.dot(a.astype(jnp.bfloat16), w1_ref[...],
                preferred_element_type=jnp.float32) + b1_ref[...]
    a = jnp.maximum(a, 0.0)
    a = jnp.dot(a.astype(jnp.bfloat16), wf_ref[...],
                preferred_element_type=jnp.float32) + bf_ref[...]
    a = jnp.maximum(a, 0.0)
    a = jnp.dot(a.astype(jnp.bfloat16), wo_ref[...],
                preferred_element_type=jnp.float32) + bo_ref[...]
    o_ref[...] = a.astype(o_ref.dtype)


def _choose_row_tile(b):
    """Fixed large row tiles (deep MXU M, few grid steps); small batches get a
    single 8-aligned step.  Large batches always yield >=2 'parallel' grid
    steps so both v7x TensorCores are used."""
    b8 = _round_up(max(b, 1), 8)
    if b8 <= 512:
        return b8            # one step; padding overhead is a handful of rows
    if b8 < 1024:
        return 256           # >=2 steps without excessive tail padding
    return 512


def qnetwork_forward(x_nhwc, fp):
    """x_nhwc: (b, h, w, c) f32; fp: fused params from fuse_params()."""
    b, h, w, c = x_nhwc.shape
    hwc = h * w * c
    kpad = fp["w0"].shape[0]          # lane-aligned input feature dim
    npad = fp["wo"].shape[1]          # lane-dense (128-multiple) output dim
    act = fp["act"]
    assert kpad >= hwc

    tb = _choose_row_tile(b)
    b_pad = _round_up(b, tb)

    # PyTorch's x.view((b, c, h, w)) is a raw-buffer reinterpretation; the
    # fused conv_0 matrix already addresses the flat NHWC buffer, so a flat
    # reshape suffices.  Cast to bf16 (halves the HBM read) and zero-pad the
    # feature dim to a 128-lane multiple and the batch to the row tile.
    x_flat = x_nhwc.reshape(b, hwc).astype(jnp.bfloat16)
    x_flat = jnp.pad(x_flat, ((0, b_pad - b), (0, kpad - hwc)))

    out = pl.pallas_call(
        _qnet_kernel,
        out_shape=jax.ShapeDtypeStruct((b_pad, npad), jnp.float32),
        grid=(b_pad // tb,),
        in_specs=[
            pl.BlockSpec((tb, kpad), lambda i: (i, 0)),
            pl.BlockSpec(fp["w0"].shape, lambda i: (0, 0)),
            pl.BlockSpec(fp["b0"].shape, lambda i: (0, 0)),
            pl.BlockSpec(fp["w1"].shape, lambda i: (0, 0)),
            pl.BlockSpec(fp["b1"].shape, lambda i: (0, 0)),
            pl.BlockSpec(fp["wf"].shape, lambda i: (0, 0)),
            pl.BlockSpec(fp["bf"].shape, lambda i: (0, 0)),
            pl.BlockSpec(fp["wo"].shape, lambda i: (0, 0)),
            pl.BlockSpec(fp["bo"].shape, lambda i: (0, 0)),
        ],
        out_specs=pl.BlockSpec((tb, npad), lambda i: (i, 0)),
        compiler_params=pltpu.CompilerParams(
            dimension_semantics=("parallel",)),
    )(x_flat, fp["w0"], fp["b0"], fp["w1"], fp["b1"],
      fp["wf"], fp["bf"], fp["wo"], fp["bo"])

    return out[:b, :act]


# --------------------------- parameter handling --------------------------- #
def init_torch_like_params(key, c, act_shape):
    """PyTorch-default U(-1/sqrt(fan_in), +1/sqrt(fan_in)) init, original layouts."""
    ks = jax.random.split(key, 8)

    def unif(k, shape, fan_in):
        bound = 1.0 / np.sqrt(float(fan_in))
        return jax.random.uniform(k, shape, jnp.float32, -bound, bound)

    return {
        "w_conv0": unif(ks[0], (16, c, 4, 4), c * 16),
        "b_conv0": unif(ks[1], (16,), c * 16),
        "w_conv1": unif(ks[2], (32, 16, 2, 2), 16 * 4),
        "b_conv1": unif(ks[3], (32,), 16 * 4),
        "w_fc0":   unif(ks[4], (64, 32), 32),
        "b_fc0":   unif(ks[5], (64,), 32),
        "w_out":   unif(ks[6], (act_shape, 64), 64),
        "b_out":   unif(ks[7], (act_shape,), 64),
    }


def fuse_params(params, obs_shape):
    """One-time host-side prep: bake conv_0's im2col (under the NCHW view of the
    NHWC buffer) into a dense lane-aligned matrix, permute conv_1's weight to
    match, pre-transpose the fc weights to (in, out), pad the output weight to
    128 lanes, and store matmul operands in bf16 (biases stay f32)."""
    h, w, c = obs_shape
    w0 = np.asarray(params["w_conv0"], np.float32)   # (16, c, 4, 4)
    b0 = np.asarray(params["b_conv0"], np.float32)
    w1 = np.asarray(params["w_conv1"], np.float32)   # (32, 16, 2, 2)
    k0, s0, oc0 = 4, 2, w0.shape[0]
    k1, s1, oc1 = 2, 2, w1.shape[0]
    oh0, ow0 = (h - k0) // s0 + 1, (w - k0) // s0 + 1
    oh1, ow1 = (oh0 - k1) // s1 + 1, (ow0 - k1) // s1 + 1
    # TODO(synk): the fused path assumes conv_1 collapses to a single spatial
    # position (the only case in which the module's x.view((-1, 32)) flatten
    # keeps one row per batch element); other obs_shapes are not handled here.
    assert (oh1, ow1) == (1, 1) and (oh0, ow0) == (k1, k1), (oh0, ow0, oh1, ow1)

    hwc = h * w * c
    kpad = max(128, _round_up(hwc, 128))             # lane-aligned K for matmul 0

    # conv_0 as a dense (kpad, oh0*ow0*16) matrix acting on the flat NHWC
    # buffer (identical addressing to PyTorch's NCHW .view reinterpretation).
    # Rows hwc..kpad stay zero so the zero-padded x lanes contribute nothing.
    w0_full = np.zeros((kpad, oh0 * ow0 * oc0), np.float32)
    for ph in range(oh0):
        for pw in range(ow0):
            p = ph * ow0 + pw
            for kh in range(k0):
                for kw in range(k0):
                    rows = np.arange(c) * (h * w) + (ph * s0 + kh) * w + (pw * s0 + kw)
                    w0_full[rows, p * oc0:(p + 1) * oc0] = w0[:, :, kh, kw].T
    b0_full = np.tile(b0, oh0 * ow0)                                   # (oh0*ow0*16,)

    # conv_1: conv_0 activation columns are ordered (pos_h, pos_w, channel),
    # so permute W1 (oc, ic, kh, kw) -> (kh, kw, ic, oc) and flatten.
    w1_eff = np.transpose(w1, (2, 3, 1, 0)).reshape(k1 * k1 * oc0, oc1)

    wf = np.asarray(params["w_fc0"], np.float32).T                     # (32, 64)
    bfv = np.asarray(params["b_fc0"], np.float32)
    wo = np.asarray(params["w_out"], np.float32).T                     # (64, act)
    bo = np.asarray(params["b_out"], np.float32)
    act = wo.shape[1]
    npad = max(128, _round_up(act, 128))             # lane-dense output store

    wo_pad = np.zeros((wo.shape[0], npad), np.float32)
    wo_pad[:, :act] = wo
    bo_pad = np.zeros((npad,), np.float32)
    bo_pad[:act] = bo

    bf16, f32 = jnp.bfloat16, jnp.float32
    return {
        "w0": jnp.asarray(w0_full, bf16),
        "b0": jnp.asarray(b0_full, f32).reshape(1, -1),
        "w1": jnp.asarray(w1_eff, bf16),
        "b1": jnp.asarray(params["b_conv1"], f32).reshape(1, -1),
        "wf": jnp.asarray(wf, bf16),
        "bf": jnp.asarray(bfv, f32).reshape(1, -1),
        "wo": jnp.asarray(wo_pad, bf16),
        "bo": jnp.asarray(bo_pad, f32).reshape(1, -1),
        "act": act,
    }


# ------------------------- pure-JAX reference ----------------------------- #
def qnetwork_reference(x_nhwc, params):
    """Straightforward f32 im2col reproduction of the PyTorch forward (checking)."""
    b, h, w, c = x_nhwc.shape
    x = x_nhwc.reshape(b, c, h, w)   # .view reinterpretation, NOT a permute

    def conv(x_nchw, wgt, bias, k, s):
        bb, ci, hh, ww = x_nchw.shape
        oh, ow = (hh - k) // s + 1, (ww - k) // s + 1
        cols = []
        for ph in range(oh):
            for pw in range(ow):
                patch = x_nchw[:, :, ph * s:ph * s + k, pw * s:pw * s + k]
                cols.append(patch.reshape(bb, ci * k * k))
        cols = jnp.stack(cols, axis=1)                                  # (b, oh*ow, ci*k*k)
        wmat = wgt.reshape(wgt.shape[0], -1).T                          # (ci*k*k, oc)
        y = jnp.einsum("bpi,io->bpo", cols, wmat,
                       precision=jax.lax.Precision.HIGHEST) + bias
        return y.reshape(bb, oh, ow, wgt.shape[0]).transpose(0, 3, 1, 2)

    y = jax.nn.relu(conv(x, params["w_conv0"], params["b_conv0"], 4, 2))
    y = jax.nn.relu(conv(y, params["w_conv1"], params["b_conv1"], 2, 2))
    y = y.reshape(-1, y.shape[1])
    y = jax.nn.relu(y @ params["w_fc0"].T + params["b_fc0"])
    return y @ params["w_out"].T + params["b_out"]


if __name__ == "__main__":
    key = jax.random.PRNGKey(0)
    k_x, k_p = jax.random.split(key)

    # obs_shape = (h, w, c) = (6, 6, 4): conv_0 -> 2x2 spatial, conv_1 -> 1x1,
    # so the flatten yields exactly 32 features per batch element.
    batch, h, w, c = 2, 6, 6, 4
    act_shape = 8

    x = jax.random.normal(k_x, (batch, h, w, c), jnp.float32)
    params = init_torch_like_params(k_p, c, act_shape)
    fused = fuse_params(params, (h, w, c))

    q = qnetwork_forward(x, fused)
    q = jax.block_until_ready(q)
    assert q.shape == (batch, act_shape), q.shape

    # bf16 MXU operands vs f32 HIGHEST reference: tolerance widened accordingly.
    q_ref = qnetwork_reference(x, params)
    err = float(jnp.max(jnp.abs(q - q_ref)))
    assert jnp.allclose(q, q_ref, rtol=3e-2, atol=3e-2), err

    print("KERNEL_OK")
</pallas_src>

<mosaic_0001>
module attributes {stable_mosaic.version = 11 : i64} {
  func.func @_qnet_kernel(%arg0: i32, %arg1: memref<8x256xbf16, #tpu.memory_space<vmem>>, %arg2: memref<256x64xbf16, #tpu.memory_space<vmem>>, %arg3: memref<1x64xf32, #tpu.memory_space<vmem>>, %arg4: memref<64x32xbf16, #tpu.memory_space<vmem>>, %arg5: memref<1x32xf32, #tpu.memory_space<vmem>>, %arg6: memref<32x64xbf16, #tpu.memory_space<vmem>>, %arg7: memref<1x64xf32, #tpu.memory_space<vmem>>, %arg8: memref<64x128xbf16, #tpu.memory_space<vmem>>, %arg9: memref<1x128xf32, #tpu.memory_space<vmem>>, %arg10: memref<8x128xf32, #tpu.memory_space<vmem>>) attributes {dimension_semantics = [#tpu.dimension_semantics<parallel>], iteration_bounds = array<i64: 1>, scalar_prefetch = 0 : i64, scratch_operands = 0 : i64, tpu.core_type = #tpu.core_type<tc>, window_params = [{transform_indices = @transform_0, window_bounds = array<i64: 8, 256>}, {pipeline_mode = #tpu.pipeline_mode<synchronous>, transform_indices = @transform_1, window_bounds = array<i64: 256, 64>}, {pipeline_mode = #tpu.pipeline_mode<synchronous>, transform_indices = @transform_2, window_bounds = array<i64: 1, 64>}, {pipeline_mode = #tpu.pipeline_mode<synchronous>, transform_indices = @transform_3, window_bounds = array<i64: 64, 32>}, {pipeline_mode = #tpu.pipeline_mode<synchronous>, transform_indices = @transform_4, window_bounds = array<i64: 1, 32>}, {pipeline_mode = #tpu.pipeline_mode<synchronous>, transform_indices = @transform_5, window_bounds = array<i64: 32, 64>}, {pipeline_mode = #tpu.pipeline_mode<synchronous>, transform_indices = @transform_6, window_bounds = array<i64: 1, 64>}, {pipeline_mode = #tpu.pipeline_mode<synchronous>, transform_indices = @transform_7, window_bounds = array<i64: 64, 128>}, {pipeline_mode = #tpu.pipeline_mode<synchronous>, transform_indices = @transform_8, window_bounds = array<i64: 1, 128>}, {transform_indices = @transform_9, window_bounds = array<i64: 8, 128>}]} {
    %c0 = arith.constant 0 : index
    %c0_0 = arith.constant 0 : index
    %0 = vector.load %arg1[%c0, %c0_0] : memref<8x256xbf16, #tpu.memory_space<vmem>>, vector<8x256xbf16>
    %c0_1 = arith.constant 0 : index
    %c0_2 = arith.constant 0 : index
    %1 = vector.load %arg2[%c0_1, %c0_2] : memref<256x64xbf16, #tpu.memory_space<vmem>>, vector<256x64xbf16>
    %cst = arith.constant dense<0.000000e+00> : vector<8x64xf32>
    %2 = tpu.matmul %0, %1, %cst {dimension_numbers = #tpu.dot_dimension_numbers<[1], [0], [0], [1], [0, 0, 1, 1], [], []>} : vector<8x256xbf16>, vector<256x64xbf16>, vector<8x64xf32> -> vector<8x64xf32>
    %c0_3 = arith.constant 0 : index
    %c0_4 = arith.constant 0 : index
    %3 = vector.load %arg3[%c0_3, %c0_4] : memref<1x64xf32, #tpu.memory_space<vmem>>, vector<1x64xf32>
    %4 = vector.broadcast %3 : vector<1x64xf32> to vector<8x64xf32>
    %5 = arith.addf %2, %4 : vector<8x64xf32>
    %cst_5 = arith.constant 0.000000e+00 : f32
    %6 = vector.broadcast %cst_5 : f32 to vector<8x64xf32>
    %7 = arith.maximumf %5, %6 : vector<8x64xf32>
    %8 = arith.truncf %7 : vector<8x64xf32> to vector<8x64xbf16>
    %c0_6 = arith.constant 0 : index
    %c0_7 = arith.constant 0 : index
    %9 = vector.load %arg4[%c0_6, %c0_7] : memref<64x32xbf16, #tpu.memory_space<vmem>>, vector<64x32xbf16>
    %cst_8 = arith.constant dense<0.000000e+00> : vector<8x32xf32>
    %10 = tpu.matmul %8, %9, %cst_8 {dimension_numbers = #tpu.dot_dimension_numbers<[1], [0], [0], [1], [0, 0, 1, 1], [], []>} : vector<8x64xbf16>, vector<64x32xbf16>, vector<8x32xf32> -> vector<8x32xf32>
    %c0_9 = arith.constant 0 : index
    %c0_10 = arith.constant 0 : index
    %11 = vector.load %arg5[%c0_9, %c0_10] : memref<1x32xf32, #tpu.memory_space<vmem>>, vector<1x32xf32>
    %12 = vector.broadcast %11 : vector<1x32xf32> to vector<8x32xf32>
    %13 = arith.addf %10, %12 : vector<8x32xf32>
    %cst_11 = arith.constant 0.000000e+00 : f32
    %14 = vector.broadcast %cst_11 : f32 to vector<8x32xf32>
    %15 = arith.maximumf %13, %14 : vector<8x32xf32>
    %16 = arith.truncf %15 : vector<8x32xf32> to vector<8x32xbf16>
    %c0_12 = arith.constant 0 : index
    %c0_13 = arith.constant 0 : index
    %17 = vector.load %arg6[%c0_12, %c0_13] : memref<32x64xbf16, #tpu.memory_space<vmem>>, vector<32x64xbf16>
    %cst_14 = arith.constant dense<0.000000e+00> : vector<8x64xf32>
    %18 = tpu.matmul %16, %17, %cst_14 {dimension_numbers = #tpu.dot_dimension_numbers<[1], [0], [0], [1], [0, 0, 1, 1], [], []>} : vector<8x32xbf16>, vector<32x64xbf16>, vector<8x64xf32> -> vector<8x64xf32>
    %c0_15 = arith.constant 0 : index
    %c0_16 = arith.constant 0 : index
    %19 = vector.load %arg7[%c0_15, %c0_16] : memref<1x64xf32, #tpu.memory_space<vmem>>, vector<1x64xf32>
    %20 = vector.broadcast %19 : vector<1x64xf32> to vector<8x64xf32>
    %21 = arith.addf %18, %20 : vector<8x64xf32>
    %cst_17 = arith.constant 0.000000e+00 : f32
    %22 = vector.broadcast %cst_17 : f32 to vector<8x64xf32>
    %23 = arith.maximumf %21, %22 : vector<8x64xf32>
    %24 = arith.truncf %23 : vector<8x64xf32> to vector<8x64xbf16>
    %c0_18 = arith.constant 0 : index
    %c0_19 = arith.constant 0 : index
    %25 = vector.load %arg8[%c0_18, %c0_19] : memref<64x128xbf16, #tpu.memory_space<vmem>>, vector<64x128xbf16>
    %cst_20 = arith.constant dense<0.000000e+00> : vector<8x128xf32>
    %26 = tpu.matmul %24, %25, %cst_20 {dimension_numbers = #tpu.dot_dimension_numbers<[1], [0], [0], [1], [0, 0, 1, 1], [], []>} : vector<8x64xbf16>, vector<64x128xbf16>, vector<8x128xf32> -> vector<8x128xf32>
    %c0_21 = arith.constant 0 : index
    %c0_22 = arith.constant 0 : index
    %27 = vector.load %arg9[%c0_21, %c0_22] : memref<1x128xf32, #tpu.memory_space<vmem>>, vector<1x128xf32>
    %28 = vector.broadcast %27 : vector<1x128xf32> to vector<8x128xf32>
    %29 = arith.addf %26, %28 : vector<8x128xf32>
    %c0_23 = arith.constant 0 : index
    %c0_24 = arith.constant 0 : index
    %30 = vector.load %arg10[%c0_23, %c0_24] : memref<8x128xf32, #tpu.memory_space<vmem>>, vector<8x128xf32>
    tpu.vector_store %arg10[%c0_23, %c0_24], %29 {strides = array<i32>} : memref<8x128xf32, #tpu.memory_space<vmem>>, vector<8x128xf32>,
    return
  }
  func.func @transform_0(%arg0: i32) -> (i32, i32) {
    %c0_i32 = arith.constant 0 : i32
    %c0_i32_0 = arith.constant 0 : i32
    return %arg0, %c0_i32 : i32, i32
  }
  func.func @transform_1(%arg0: i32) -> (i32, i32) {
    %c0_i32 = arith.constant 0 : i32
    %c0_i32_0 = arith.constant 0 : i32
    %c0_i32_1 = arith.constant 0 : i32
    return %c0_i32, %c0_i32_0 : i32, i32
  }
  func.func @transform_2(%arg0: i32) -> (i32, i32) {
    %c0_i32 = arith.constant 0 : i32
    %c0_i32_0 = arith.constant 0 : i32
    %c0_i32_1 = arith.constant 0 : i32
    return %c0_i32, %c0_i32_0 : i32, i32
  }
  func.func @transform_3(%arg0: i32) -> (i32, i32) {
    %c0_i32 = arith.constant 0 : i32
    %c0_i32_0 = arith.constant 0 : i32
    %c0_i32_1 = arith.constant 0 : i32
    return %c0_i32, %c0_i32_0 : i32, i32
  }
  func.func @transform_4(%arg0: i32) -> (i32, i32) {
    %c0_i32 = arith.constant 0 : i32
    %c0_i32_0 = arith.constant 0 : i32
    %c0_i32_1 = arith.constant 0 : i32
    return %c0_i32, %c0_i32_0 : i32, i32
  }
  func.func @transform_5(%arg0: i32) -> (i32, i32) {
    %c0_i32 = arith.constant 0 : i32
    %c0_i32_0 = arith.constant 0 : i32
    %c0_i32_1 = arith.constant 0 : i32
    return %c0_i32, %c0_i32_0 : i32, i32
  }
  func.func @transform_6(%arg0: i32) -> (i32, i32) {
    %c0_i32 = arith.constant 0 : i32
    %c0_i32_0 = arith.constant 0 : i32
    %c0_i32_1 = arith.constant 0 : i32
    return %c0_i32, %c0_i32_0 : i32, i32
  }
  func.func @transform_7(%arg0: i32) -> (i32, i32) {
    %c0_i32 = arith.constant 0 : i32
    %c0_i32_0 = arith.constant 0 : i32
    %c0_i32_1 = arith.constant 0 : i32
    return %c0_i32, %c0_i32_0 : i32, i32
  }
  func.func @transform_8(%arg0: i32) -> (i32, i32) {
    %c0_i32 = arith.constant 0 : i32
    %c0_i32_0 = arith.constant 0 : i32
    %c0_i32_1 = arith.constant 0 : i32
    return %c0_i32, %c0_i32_0 : i32, i32
  }
  func.func @transform_9(%arg0: i32) -> (i32, i32) {
    %c0_i32 = arith.constant 0 : i32
    %c0_i32_0 = arith.constant 0 : i32
    return %arg0, %c0_i32 : i32, i32
  }
}

</mosaic_0001>

<bundles_post_ra>
// kernel: tpu_custom_call.1
= control target key start
LH: loop header
LB: loop body
LE: loop exit
PB: predicated region body
PF: predicated region fallthrough
CT: control target
= control target key end

     0   :  { %v625_v2 = vmov 0.0   ;;  %s792_s0 = inlined_call_operand.vmem [shape: bf16[8,256], index: 0, kind: input, shape index: {}]   ;;  %s793_s1 = inlined_call_operand.vmem [shape: bf16[256,64], index: 1, kind: input, shape index: {}]   ;;  %s794_s2 = inlined_call_operand.vmem [shape: f32[1,64], index: 2, kind: input, shape index: {}]   ;;  %s795_s3 = inlined_call_operand.vmem [shape: bf16[64,32], index: 3, kind: input, shape index: {}]   ;;  %s796_s4 = inlined_call_operand.vmem [shape: f32[1,32], index: 4, kind: input, shape index: {}]   ;;  %s797_s5 = inlined_call_operand.vmem [shape: bf16[32,64], index: 5, kind: input, shape index: {}]   ;;  %s798_s6 = inlined_call_operand.vmem [shape: f32[1,64], index: 6, kind: input, shape index: {}]   ;;  %s799_s7 = inlined_call_operand.vmem [shape: bf16[64,128], index: 7, kind: input, shape index: {}]   ;;  %s800_s8 = inlined_call_operand.vmem [shape: f32[1,128], index: 8, kind: input, shape index: {}]   ;;  %s801_s9 = inlined_call_operand.hbm [shape: f32[8,128], index: 9, kind: output, shape index: {}]  }
   0x1   :  { %v575_v0 = vld [vmem:[%s793_s1 + $0x78] sm:$0xff]   ;;  %540 = vmatprep.subr.bf16.mxu1 %v625_v2  ;;  %v577_v3 = vld [vmem:[%s793_s1 + $0x70] sm:$0xff]   ;;  %v579_v5 = vld [vmem:[%s793_s1 + $0x68] sm:$0xff]  }
   0x2   :  { %v576_v1 = vld [vmem:[%s793_s1 + $0x38] sm:$0xff]   ;;  %505 = vmatprep.subr.bf16.mxu0 %v575_v0  ;;  %v578_v4 = vld [vmem:[%s793_s1 + $0x30] sm:$0xff]   ;;  %v580_v6 = vld [vmem:[%s793_s1 + $0x28] sm:$0xff]  }
   0x3   :  { %506 = vmatpush3.bf16.msra.mxu0 %v576_v1  ;;  %v581_v7 = vld [vmem:[%s793_s1 + $0x60] sm:$0xff]   ;;  %v583_v9 = vld [vmem:[%s793_s1 + $0x58] sm:$0xff]   ;;  %v585_v11 = vld [vmem:[%s793_s1 + $0x50] sm:$0xff]  }
   0x4   :  { %507 = vmatprep.subr.bf16.mxu0 %v577_v3  ;;  %v582_v8 = vld [vmem:[%s793_s1 + $0x20] sm:$0xff]   ;;  %v584_v10 = vld [vmem:[%s793_s1 + $0x18] sm:$0xff]   ;;  %v586_v13 = vld [vmem:[%s793_s1 + $0x10] sm:$0xff]  }
   0x5   :  { %v34_v12 = vld [vmem:[%s792_s0] sm:$0xff]  ;;  %v593_v15 = vld [vmem:[%s795_s3 + $0x18] sm:$0xff]   ;;  %v587_v16 = vld [vmem:[%s793_s1 + $0x48] sm:$0xff]  }
   0x6   :  { %v472_v14 = vcombine.high %v34_v12, %v34_v12  ;;  %541 = vmatpush3.bf16.msra.mxu1 %v593_v15  ;;  %v588_v17 = vld [vmem:[%s793_s1 + $0x8] sm:$0xff]  }
   0x7   :  { %508 = vmatpush3.bf16.msra.mxu0 %v578_v4  ;;  %542 = vmatprep.subr.bf16.mxu1 %v625_v2 }
   0x8   :  { %509 = vmatprep.subr.bf16.mxu0 %v579_v5  ;;  %209 = vmatprep.mubr.bf16.mxu0 %v472_v14 }
   0xb   :  { %510 = vmatpush3.bf16.msra.mxu0 %v580_v6 }
   0xc   :  { %511 = vmatprep.subr.bf16.mxu0 %v581_v7 }
   0xf   :  { %512 = vmatpush3.bf16.msra.mxu0 %v582_v8 }
  0x10   :  { %513 = vmatprep.subr.bf16.mxu0 %v583_v9 }
  0x13   :  { %514 = vmatpush3.bf16.msra.mxu0 %v584_v10 }
  0x14   :  { %515 = vmatprep.subr.bf16.mxu0 %v585_v11 }
  0x17   :  { %516 = vmatpush3.bf16.msra.mxu0 %v586_v13 }
  0x18   :  { %14 = vsyncpa [#allocation3], 0  ;;  %517 = vmatprep.subr.bf16.mxu0 %v587_v16  ;;  %v589_v18 = vld [vmem:[%s793_s1 + $0x40] sm:$0xff]   ;;  %v471_v20 = vcombine.low %v34_v12, %v34_v12  ;;  %v594_v21 = vld [vmem:[%s795_s3 + $0x10] sm:$0xff]   ;;  %vm626_vm0 = vmmov 0   ;;  %vm258_vm1 = vcmask 523264  }
  0x19   :  { %v590_v19 = vld [vmem:[%s793_s1] sm:$0xff]   ;;  %543 = vmatpush3.bf16.msra.mxu1 %v594_v21  ;;  %v595_v22 = vld [vmem:[%s795_s3 + $0x8] sm:$0xff]   ;;  %548 = vmatprep.mubr.msk.bf16.mxu1 %vm626_vm0, %v625_v2  ;;  %vm327_vm2 = vcmask 261120   ;;  %v599_v41 = vld [vmem:[%s799_s7 + $0x18] sm:$0xff]   ;;  %s627_s22 = smov [#allocation2]  }
  0x1a   :  { %544 = vmatprep.subr.bf16.mxu1 %v625_v2  ;;  %v596_v23 = vld [vmem:[%s795_s3] sm:$0xff]   ;;  %v597_v32 = vld [vmem:[%s797_s5 + $0x8] sm:$0xff]   ;;  %v600_v44 = vld [vmem:[%s799_s7 + $0x10] sm:$0xff]  }
  0x1b   :  { %518 = vmatpush3.bf16.msra.mxu0 %v588_v17  ;;  %v470_v25 = vld [vmem:[%s794_s2] ss:$0 sm:$0xff]  ;;  %v601_v45 = vld [vmem:[%s799_s7 + $0x8] sm:$0xff]  }
  0x1c   :  { %519 = vmatprep.subr.bf16.mxu0 %v589_v18  ;;  %v598_v34 = vld [vmem:[%s797_s5] sm:$0xff]  }
  0x1d   :  { %545 = vmatpush3.bf16.msra.mxu1 %v595_v22  ;;  %v489_v35 = vld [vmem:[%s796_s4] ss:$0 sm:$0xff] }
  0x1e   :  { %546 = vmatprep.subr.bf16.mxu1 %v625_v2  ;;  %v602_v46 = vld [vmem:[%s799_s7] sm:$0xff]   ;;  %s462_s7 = sshll.u32 %s627_s22, 4  ;;  %s463_s7 = int_to_ptr.vmem [resolvable:$true] %s462_s7 }
  0x1f   :  { %520 = vmatpush3.bf16.msra.mxu0 %v590_v19  ;;  %v495_v47 = vld [vmem:[%s798_s6] ss:$0 sm:$0xff]  ;;  %s603_s6 = scalar_lea.vmem %s463_s7, 128  ;;  %p608_p1 = scmp.lt.s32.totalorder %s463_s7, %s463_s7 }
  0x20   :  { %v499_v55 = vld [vmem:[%s800_s8] ss:$0 sm:$0xff]  ;;  %p604_p0 = scmp.ne.s32.totalorder %s463_s7, %s603_s6  ;;  %p609_p2 = scmp.lt.s32.totalorder %s603_s6, %s603_s6 }
  0x21   :  { %547 = vmatpush3.bf16.msra.mxu1 %v596_v23 }
  0x22   :  { %210 = vmatmul.mubr.bf16.vlgmr.msra.gmra.mxu0 %v471_v20  ;;  %552 = vmatprep.subr.bf16.mxu1 %v625_v2  ;;  %p610_p3 = por %p609_p2, %p608_p1 }
  0x24   :  { %p611_p4 = pnand %p610_p3, %p604_p0 }
  0xe2   :  { %v521_v24 = vpop.f32.mrf.mxu0 }
  0xe4   :  { %v522_v26 = vpop.f32.mrf.mxu0 }
  0xe5   :  { %v523_v27 = vadd.f32 %v522_v26, %v521_v24 }
  0xe6   :  { %v524_v28 = vpop.f32.mrf.mxu0 }
  0xe7   :  { %v212_v29 = vadd.f32 %v523_v27, %v470_v25 }
  0xe8   :  { %v525_v30 = vpop.f32.mrf.mxu0 }
  0xe9   :  { %v217_v31 = vmax.f32 %v212_v29, 0.0 }
  0xeb   :  { %v218_v33 = vpack.c.bf16 %v217_v31, %v217_v31 }
  0xed   :  { %549 = vmatmul.mubr.msk.bf16.vlgmr.msra.gmra.mxu1 %vm258_vm1, %v218_v33 }
  0xee   :  { %553 = vmatpush3.bf16.msra.mxu1 %v597_v32  ;;  %556 = vmatprep.mubr.msk.bf16.mxu1 %vm626_vm0, %v625_v2 }
  0xef   :  { %554 = vmatprep.subr.bf16.mxu1 %v625_v2 }
  0xf2   :  { %555 = vmatpush3.bf16.msra.mxu1 %v598_v34 }
  0xf3   :  { %560 = vmatprep.subr.bf16.mxu1 %v625_v2 }
 0x1ad   :  { %v296_v36 = vpop.f32.mrf.mxu1 }
 0x1ae   :  { %v297_v37 = vadd.f32 %v489_v35, %v296_v36 }
 0x1af   :  { %v550_v38 = vpop.f32.mrf.mxu1 }
 0x1b0   :  { %v302_v39 = vmax.f32 %v297_v37, 0.0 }
 0x1b1   :  { %v299_v40 = vpop.f32.mrf.mxu1 }
 0x1b2   :  { %v303_v42 = vpack.c.bf16 %v302_v39, %v302_v39 }
 0x1b3   :  { %v551_v43 = vpop.f32.mrf.mxu1 }
 0x1b4   :  { %557 = vmatmul.mubr.msk.bf16.vlgmr.msra.gmra.mxu1 %vm327_vm2, %v303_v42 }
 0x1b5   :  { %561 = vmatpush3.bf16.msra.mxu1 %v599_v41  ;;  %568 = vmatprep.mubr.msk.bf16.mxu1 %vm626_vm0, %v625_v2 }
 0x1b6   :  { %562 = vmatprep.subr.bf16.mxu1 %v625_v2 }
 0x1b9   :  { %563 = vmatpush3.bf16.msra.mxu1 %v600_v44 }
 0x1ba   :  { %564 = vmatprep.subr.bf16.mxu1 %v625_v2 }
 0x1bd   :  { %565 = vmatpush3.bf16.msra.mxu1 %v601_v45 }
 0x1be   :  { %566 = vmatprep.subr.bf16.mxu1 %v625_v2 }
 0x1c1   :  { %567 = vmatpush3.bf16.msra.mxu1 %v602_v46 }
 0x274   :  { %v365_v48 = vpop.f32.mrf.mxu1 }
 0x275   :  { %v366_v49 = vadd.f32 %v495_v47, %v365_v48 }
 0x276   :  { %v558_v50 = vpop.f32.mrf.mxu1 }
 0x277   :  { %v371_v51 = vmax.f32 %v366_v49, 0.0 }
 0x278   :  { %v368_v52 = vpop.f32.mrf.mxu1 }
 0x279   :  { %v372_v53 = vpack.c.bf16 %v371_v51, %v371_v51 }
 0x27a   :  { %v559_v54 = vpop.f32.mrf.mxu1 }
 0x27b   :  { %569 = vmatmul.mubr.msk.bf16.vlgmr.msra.gmra.mxu1 %vm258_vm1, %v372_v53 }
 0x33b   :  { %v449_v56 = vpop.f32.mrf.mxu1 }
 0x33c   :  { %v450_v57 = vadd.f32 %v499_v55, %v449_v56 }
 0x33d   :  { %v570_v58 = vpop.f32.mrf.mxu1 }
 0x33e   :  { %455 = vst [vmem:[#allocation2] sm:$0xff] %v450_v57 }
 0x33f   :  { %v452_v59 = vpop.f32.mrf.mxu1 }
 0x340   :  { %614 = shalt.err (!%p611_p4)
}
 0x341   :  { %465 = dma.vmem_to_hbm [thread:$0]  %s463_s7, 128, %s801_s9, [#allocation3]   ;;  %v571_v60 = vpop.f32.mrf.mxu1 }
 0x342   :  { %623 = dma.done.wait [#allocation3], 128  }
 0x343   :  { %624 = vsyncadd [#allocation3], 4294967168 }
 0x344   :  { %469 = vsyncpa [#allocation3], 1 }

</bundles_post_ra>
